<compile_context>
chip_gen: v6e
topology: v6e:2x2x1
jax: 0.10.0
libtpu: 0.0.40
codegen_flags: <defaults>
</compile_context>

<pallas_src>
import functools

import jax
import jax.numpy as jnp
from jax.experimental import pallas as pl
from jax.experimental.pallas import tpu as pltpu

_LANE = 128     # lane width (last dim)
_SUBLANE = 8    # sublane width (second-to-last dim)


def _round_up(n, k):
    return ((n + k - 1) // k) * k


def mlp_kernel(x_ref, w1_ref, b1_ref, w2_ref, b2_ref, w3_ref, b3_ref, o_ref):
    mxu_dtype = w1_ref.dtype              # weights carry the MXU operand dtype
    x = x_ref[...].astype(mxu_dtype)      # VPU cast, hidden under the input DMA

    # h1 = relu(x @ W1 + b1)   (f32 accumulation, f32 bias / ReLU)
    h1 = jnp.dot(x, w1_ref[...], preferred_element_type=jnp.float32) + b1_ref[...]
    h1 = jnp.maximum(h1, 0.0)

    # h2 = relu(h1 @ W2 + b2)
    h2 = jnp.dot(h1.astype(mxu_dtype), w2_ref[...],
                 preferred_element_type=jnp.float32) + b2_ref[...]
    h2 = jnp.maximum(h2, 0.0)

    # logits = h2 @ W3 + b3   (padded classes carry bias -1e30 -> drop out of max/sum)
    logits = jnp.dot(h2.astype(mxu_dtype), w3_ref[...],
                     preferred_element_type=jnp.float32) + b3_ref[...]

    # numerically stable log_softmax over the lane (class) axis
    m = jnp.max(logits, axis=-1, keepdims=True)
    z = logits - m
    lse = jnp.log(jnp.sum(jnp.exp(z), axis=-1, keepdims=True))
    o_ref[...] = (z - lse).astype(o_ref.dtype)


def prepare_params(params, *, mxu_dtype=jnp.bfloat16):
    """One-time, out-of-jit parameter prep: cast weights to the MXU operand dtype
    and pad (w3, b3) so the class dim is a lane-dense multiple of 128.
    Biases stay f32 (the -1e30 padding sentinel must remain f32)."""
    w3 = params["w3"]
    b3 = params["b3"].astype(jnp.float32)
    hidden_dim, out_dim = w3.shape
    out_pad = _round_up(max(out_dim, _LANE), _LANE)
    if out_pad != out_dim:
        w3 = jnp.zeros((hidden_dim, out_pad), w3.dtype).at[:, :out_dim].set(w3)
        b3 = jnp.full((1, out_pad), -1e30, jnp.float32).at[:, :out_dim].set(b3)
    return {
        "w1": params["w1"].astype(mxu_dtype), "b1": params["b1"].astype(jnp.float32),
        "w2": params["w2"].astype(mxu_dtype), "b2": params["b2"].astype(jnp.float32),
        "w3": w3.astype(mxu_dtype), "b3": b3,
    }


@functools.partial(jax.jit, static_argnames=("out_dim", "out_dtype", "batch_tile"))
def classifier_mlp_forward(x, prep, *, out_dim, out_dtype=jnp.float32,
                           batch_tile=2048):
    """x: (B, in_dim). prep: output of prepare_params(). Returns (B, out_dim)."""
    w1, b1, w2, b2, w3, b3 = (prep["w1"], prep["b1"], prep["w2"],
                              prep["b2"], prep["w3"], prep["b3"])
    B, in_dim = x.shape
    out_pad = w3.shape[1]

    # ---- batch tile: multiple of 8, large (amortize per-step overhead), capped so
    # the "parallel" grid has >= 2 steps whenever B >= 16 (v7x: 2 TensorCores).
    if B >= 2 * _SUBLANE:
        tb = min(_round_up(batch_tile, _SUBLANE),
                 _round_up(pl.cdiv(B, 2), _SUBLANE))
    else:
        tb = B          # single block == full batch dim (legal for any B)
    grid = (pl.cdiv(B, tb),)
    # Partial last block: out-of-bounds rows hold garbage, but log_softmax is
    # row-local and the output write-back is clipped to B rows, so they never
    # contaminate real rows.

    def resident(a):    # constant index_map -> block stays VMEM-resident across steps
        return pl.BlockSpec(a.shape, lambda i: (0,) * a.ndim)

    out_full = pl.pallas_call(
        mlp_kernel,
        out_shape=jax.ShapeDtypeStruct((B, out_pad), out_dtype),
        grid=grid,
        in_specs=[
            pl.BlockSpec((tb, in_dim), lambda i: (i, 0)),   # x: tiled over batch
            resident(w1), resident(b1),
            resident(w2), resident(b2),
            resident(w3), resident(b3),
        ],
        out_specs=pl.BlockSpec((tb, out_pad), lambda i: (i, 0)),
        compiler_params=pltpu.CompilerParams(
            dimension_semantics=("parallel",),
        ),
    )(x, w1, b1, w2, b2, w3, b3)

    # TODO(synk): on v5e, benchmark an unpadded (tb, out_dim) out_spec against the
    # lane-dense padded layout (padded output is ~12.8x write-amplified there).
    return out_full[:, :out_dim]


def init_params(key, in_dim, hidden_dim, out_dim):
    """Mirror the PyTorch init: weight ~ N(0, 1/sqrt(in_features)), bias = 0.
    Weights stored transposed: (in_features, out_features)."""
    k1, k2, k3 = jax.random.split(key, 3)
    w1 = jax.random.normal(k1, (in_dim, hidden_dim), jnp.float32) / jnp.sqrt(in_dim)
    w2 = jax.random.normal(k2, (hidden_dim, hidden_dim), jnp.float32) / jnp.sqrt(hidden_dim)
    w3 = jax.random.normal(k3, (hidden_dim, out_dim), jnp.float32) / jnp.sqrt(hidden_dim)
    return {
        "w1": w1, "b1": jnp.zeros((1, hidden_dim), jnp.float32),
        "w2": w2, "b2": jnp.zeros((1, hidden_dim), jnp.float32),
        "w3": w3, "b3": jnp.zeros((1, out_dim), jnp.float32),
    }


def reference_forward(x, params):
    h1 = jax.nn.relu(x @ params["w1"] + params["b1"])
    h2 = jax.nn.relu(h1 @ params["w2"] + params["b2"])
    logits = h2 @ params["w3"] + params["b3"]
    return jax.nn.log_softmax(logits, axis=1)


if __name__ == "__main__":
    key = jax.random.PRNGKey(0)
    kx, kx2, kp = jax.random.split(key, 3)

    batch, in_dim, hidden_dim, out_dim = 8, 32, 64, 10
    x = jax.random.normal(kx, (batch, in_dim), jnp.float32)
    params = init_params(kp, in_dim, hidden_dim, out_dim)
    ref = reference_forward(x, params)

    # 1) exact path (f32 MXU operands) — tight tolerance
    prep_f32 = prepare_params(params, mxu_dtype=jnp.float32)
    out_f32 = jax.block_until_ready(
        classifier_mlp_forward(x, prep_f32, out_dim=out_dim))
    assert out_f32.shape == (batch, out_dim)
    assert jnp.allclose(out_f32, ref, atol=1e-5, rtol=1e-5), "f32 mismatch vs reference"

    # 2) default fast path (bf16 MXU operands, f32 accumulation / output)
    prep_bf16 = prepare_params(params)  # bf16 weights, prepared once outside jit
    out_bf16 = jax.block_until_ready(
        classifier_mlp_forward(x, prep_bf16, out_dim=out_dim))
    assert out_bf16.dtype == jnp.float32
    assert jnp.allclose(out_bf16, ref, atol=5e-2, rtol=5e-2), "bf16 mismatch vs reference"

    # 3) multi-step parallel grid with a partial last block (B=300 not divisible by tb)
    batch2 = 300
    x2 = jax.random.normal(kx2, (batch2, in_dim), jnp.float32)
    ref2 = reference_forward(x2, params)
    out2 = jax.block_until_ready(
        classifier_mlp_forward(x2, prep_bf16, out_dim=out_dim, batch_tile=128))
    assert out2.shape == (batch2, out_dim)
    assert jnp.allclose(out2, ref2, atol=5e-2, rtol=5e-2), "tiled bf16 mismatch vs reference"

    # 4) reduced-writeback path: bf16 kernel output (looser tolerance)
    out_bf16_o = jax.block_until_ready(
        classifier_mlp_forward(x, prep_bf16, out_dim=out_dim, out_dtype=jnp.bfloat16))
    assert out_bf16_o.dtype == jnp.bfloat16
    assert jnp.allclose(out_bf16_o.astype(jnp.float32), ref, atol=1e-1, rtol=1e-1), \
        "bf16-output mismatch vs reference"

    print("KERNEL_OK")
</pallas_src>

<mosaic_0001>
module attributes {stable_mosaic.version = 11 : i64} {
  func.func @mlp_kernel(%arg0: i32, %arg1: memref<8x32xf32, #tpu.memory_space<vmem>>, %arg2: memref<32x64xf32, #tpu.memory_space<vmem>>, %arg3: memref<1x64xf32, #tpu.memory_space<vmem>>, %arg4: memref<64x64xf32, #tpu.memory_space<vmem>>, %arg5: memref<1x64xf32, #tpu.memory_space<vmem>>, %arg6: memref<64x128xf32, #tpu.memory_space<vmem>>, %arg7: memref<1x128xf32, #tpu.memory_space<vmem>>, %arg8: memref<8x128xf32, #tpu.memory_space<vmem>>) attributes {dimension_semantics = [#tpu.dimension_semantics<parallel>], iteration_bounds = array<i64: 1>, scalar_prefetch = 0 : i64, scratch_operands = 0 : i64, tpu.core_type = #tpu.core_type<tc>, window_params = [{transform_indices = @transform_0, window_bounds = array<i64: 8, 32>}, {pipeline_mode = #tpu.pipeline_mode<synchronous>, transform_indices = @transform_1, window_bounds = array<i64: 32, 64>}, {pipeline_mode = #tpu.pipeline_mode<synchronous>, transform_indices = @transform_2, window_bounds = array<i64: 1, 64>}, {pipeline_mode = #tpu.pipeline_mode<synchronous>, transform_indices = @transform_3, window_bounds = array<i64: 64, 64>}, {pipeline_mode = #tpu.pipeline_mode<synchronous>, transform_indices = @transform_4, window_bounds = array<i64: 1, 64>}, {pipeline_mode = #tpu.pipeline_mode<synchronous>, transform_indices = @transform_5, window_bounds = array<i64: 64, 128>}, {pipeline_mode = #tpu.pipeline_mode<synchronous>, transform_indices = @transform_6, window_bounds = array<i64: 1, 128>}, {transform_indices = @transform_7, window_bounds = array<i64: 8, 128>}]} {
    %c0 = arith.constant 0 : index
    %c0_0 = arith.constant 0 : index
    %0 = vector.load %arg1[%c0, %c0_0] : memref<8x32xf32, #tpu.memory_space<vmem>>, vector<8x32xf32>
    %c0_1 = arith.constant 0 : index
    %c0_2 = arith.constant 0 : index
    %1 = vector.load %arg2[%c0_1, %c0_2] : memref<32x64xf32, #tpu.memory_space<vmem>>, vector<32x64xf32>
    %cst = arith.constant dense<0.000000e+00> : vector<8x64xf32>
    %2 = tpu.matmul %0, %1, %cst {dimension_numbers = #tpu.dot_dimension_numbers<[1], [0], [0], [1], [0, 0, 1, 1], [], []>} : vector<8x32xf32>, vector<32x64xf32>, vector<8x64xf32> -> vector<8x64xf32>
    %c0_3 = arith.constant 0 : index
    %c0_4 = arith.constant 0 : index
    %3 = vector.load %arg3[%c0_3, %c0_4] : memref<1x64xf32, #tpu.memory_space<vmem>>, vector<1x64xf32>
    %4 = vector.broadcast %3 : vector<1x64xf32> to vector<8x64xf32>
    %5 = arith.addf %2, %4 : vector<8x64xf32>
    %cst_5 = arith.constant 0.000000e+00 : f32
    %6 = vector.broadcast %cst_5 : f32 to vector<8x64xf32>
    %7 = arith.maximumf %5, %6 : vector<8x64xf32>
    %c0_6 = arith.constant 0 : index
    %c0_7 = arith.constant 0 : index
    %8 = vector.load %arg4[%c0_6, %c0_7] : memref<64x64xf32, #tpu.memory_space<vmem>>, vector<64x64xf32>
    %cst_8 = arith.constant dense<0.000000e+00> : vector<8x64xf32>
    %9 = tpu.matmul %7, %8, %cst_8 {dimension_numbers = #tpu.dot_dimension_numbers<[1], [0], [0], [1], [0, 0, 1, 1], [], []>} : vector<8x64xf32>, vector<64x64xf32>, vector<8x64xf32> -> vector<8x64xf32>
    %c0_9 = arith.constant 0 : index
    %c0_10 = arith.constant 0 : index
    %10 = vector.load %arg5[%c0_9, %c0_10] : memref<1x64xf32, #tpu.memory_space<vmem>>, vector<1x64xf32>
    %11 = vector.broadcast %10 : vector<1x64xf32> to vector<8x64xf32>
    %12 = arith.addf %9, %11 : vector<8x64xf32>
    %cst_11 = arith.constant 0.000000e+00 : f32
    %13 = vector.broadcast %cst_11 : f32 to vector<8x64xf32>
    %14 = arith.maximumf %12, %13 : vector<8x64xf32>
    %c0_12 = arith.constant 0 : index
    %c0_13 = arith.constant 0 : index
    %15 = vector.load %arg6[%c0_12, %c0_13] : memref<64x128xf32, #tpu.memory_space<vmem>>, vector<64x128xf32>
    %cst_14 = arith.constant dense<0.000000e+00> : vector<8x128xf32>
    %16 = tpu.matmul %14, %15, %cst_14 {dimension_numbers = #tpu.dot_dimension_numbers<[1], [0], [0], [1], [0, 0, 1, 1], [], []>} : vector<8x64xf32>, vector<64x128xf32>, vector<8x128xf32> -> vector<8x128xf32>
    %c0_15 = arith.constant 0 : index
    %c0_16 = arith.constant 0 : index
    %17 = vector.load %arg7[%c0_15, %c0_16] : memref<1x128xf32, #tpu.memory_space<vmem>>, vector<1x128xf32>
    %18 = vector.broadcast %17 : vector<1x128xf32> to vector<8x128xf32>
    %19 = arith.addf %16, %18 : vector<8x128xf32>
    %cst_17 = arith.constant dense<0xFF800000> : vector<8xf32>
    %20 = vector.multi_reduction <maximumf>, %19, %cst_17 [1] : vector<8x128xf32> to vector<8xf32>
    %21 = vector.shape_cast %20 : vector<8xf32> to vector<8x1xf32>
    %22 = vector.broadcast %21 : vector<8x1xf32> to vector<8x128xf32>
    %23 = arith.subf %19, %22 : vector<8x128xf32>
    %24 = math.exp %23 : vector<8x128xf32>
    %cst_18 = arith.constant dense<0.000000e+00> : vector<8xf32>
    %25 = vector.multi_reduction <add>, %24, %cst_18 [1] : vector<8x128xf32> to vector<8xf32>
    %26 = vector.shape_cast %25 : vector<8xf32> to vector<8x1xf32>
    %27 = math.log %26 : vector<8x1xf32>
    %28 = vector.broadcast %27 : vector<8x1xf32> to vector<8x128xf32>
    %29 = arith.subf %23, %28 : vector<8x128xf32>
    %c0_19 = arith.constant 0 : index
    %c0_20 = arith.constant 0 : index
    %30 = vector.load %arg8[%c0_19, %c0_20] : memref<8x128xf32, #tpu.memory_space<vmem>>, vector<8x128xf32>
    tpu.vector_store %arg8[%c0_19, %c0_20], %29 {strides = array<i32>} : memref<8x128xf32, #tpu.memory_space<vmem>>, vector<8x128xf32>,
    return
  }
  func.func @transform_0(%arg0: i32) -> (i32, i32) {
    %c0_i32 = arith.constant 0 : i32
    %c0_i32_0 = arith.constant 0 : i32
    return %arg0, %c0_i32 : i32, i32
  }
  func.func @transform_1(%arg0: i32) -> (i32, i32) {
    %c0_i32 = arith.constant 0 : i32
    %c0_i32_0 = arith.constant 0 : i32
    %c0_i32_1 = arith.constant 0 : i32
    return %c0_i32, %c0_i32_0 : i32, i32
  }
  func.func @transform_2(%arg0: i32) -> (i32, i32) {
    %c0_i32 = arith.constant 0 : i32
    %c0_i32_0 = arith.constant 0 : i32
    %c0_i32_1 = arith.constant 0 : i32
    return %c0_i32, %c0_i32_0 : i32, i32
  }
  func.func @transform_3(%arg0: i32) -> (i32, i32) {
    %c0_i32 = arith.constant 0 : i32
    %c0_i32_0 = arith.constant 0 : i32
    %c0_i32_1 = arith.constant 0 : i32
    return %c0_i32, %c0_i32_0 : i32, i32
  }
  func.func @transform_4(%arg0: i32) -> (i32, i32) {
    %c0_i32 = arith.constant 0 : i32
    %c0_i32_0 = arith.constant 0 : i32
    %c0_i32_1 = arith.constant 0 : i32
    return %c0_i32, %c0_i32_0 : i32, i32
  }
  func.func @transform_5(%arg0: i32) -> (i32, i32) {
    %c0_i32 = arith.constant 0 : i32
    %c0_i32_0 = arith.constant 0 : i32
    %c0_i32_1 = arith.constant 0 : i32
    return %c0_i32, %c0_i32_0 : i32, i32
  }
  func.func @transform_6(%arg0: i32) -> (i32, i32) {
    %c0_i32 = arith.constant 0 : i32
    %c0_i32_0 = arith.constant 0 : i32
    %c0_i32_1 = arith.constant 0 : i32
    return %c0_i32, %c0_i32_0 : i32, i32
  }
  func.func @transform_7(%arg0: i32) -> (i32, i32) {
    %c0_i32 = arith.constant 0 : i32
    %c0_i32_0 = arith.constant 0 : i32
    return %arg0, %c0_i32 : i32, i32
  }
}

</mosaic_0001>

<bundles_post_ra>
// kernel: classifier_mlp_forward.1
= control target key start
LH: loop header
LB: loop body
LE: loop exit
PB: predicated region body
PF: predicated region fallthrough
CT: control target
= control target key end

     0   :  { %12 = vsyncpa [#allocation3], 0  ;;  %s682_s0 = inlined_call_operand.hbm [shape: f32[8,32], index: 0, kind: input, shape index: {}]   ;;  %s683_s1 = inlined_call_operand.hbm [shape: f32[32,64], index: 1, kind: input, shape index: {}]   ;;  %s684_s2 = inlined_call_operand.vmem [shape: f32[1,64], index: 2, kind: input, shape index: {}]   ;;  %s685_s3 = inlined_call_operand.hbm [shape: f32[64,64], index: 3, kind: input, shape index: {}]   ;;  %s686_s4 = inlined_call_operand.vmem [shape: f32[1,64], index: 4, kind: input, shape index: {}]   ;;  %s687_s5 = inlined_call_operand.hbm [shape: f32[64,128], index: 5, kind: input, shape index: {}]   ;;  %s688_s6 = inlined_call_operand.vmem [shape: f32[1,128], index: 6, kind: input, shape index: {}]   ;;  %s689_s7 = inlined_call_operand.hbm [shape: f32[8,128], index: 7, kind: output, shape index: {}]  }
   0x1   :  { %13 = vsyncpa [#allocation6], 0 }
   0x2   :  { %14 = vsyncpa [#allocation9], 0 }
   0x3   :  { %15 = vsyncpa [#allocation4], 0  ;;  %s572_s24 = smov [#allocation5]  }
   0x4   :  { %s31_s25 = sshll.u32 %s572_s24, 4  ;;  %s32_s25 = int_to_ptr.vmem [resolvable:$true] %s31_s25 }
   0x5   :  { %s472_s26 = scalar_lea.vmem %s32_s25, 512  ;;  %p477_p1 = scmp.lt.s32.totalorder %s32_s25, %s32_s25 }
   0x6   :  { %p473_p0 = scmp.ne.s32.totalorder %s32_s25, %s472_s26  ;;  %p478_p2 = scmp.lt.s32.totalorder %s472_s26, %s472_s26 }
   0x8   :  { %p479_p3 = por %p478_p2, %p477_p1 }
   0xa   :  { %p480_p4 = pnand %p479_p3, %p473_p0 }
   0xc   :  { %483 = shalt.err (!%p480_p4)
}
   0xd   :  { %s573_s27 = smov 128   ;;  %s574_s28 = smov 8  }
   0xe   :  { %37 = dma.hbm_to_vmem [thread:$0]  %s683_s1, 512, %s32_s25, [#allocation6], %s573_s27, %s573_s27, %s574_s28  }
   0xf   :  { %s575_s8 = smov [#allocation2]   ;;  %s576_s10 = smov [#allocation7]  }
  0x10   :  { %s22_s9 = sshll.u32 %s575_s8, 4  ;;  %s45_s11 = sshll.u32 %s576_s10, 4  ;;  %s23_s9 = int_to_ptr.vmem [resolvable:$true] %s22_s9  ;;  %s46_s11 = int_to_ptr.vmem [resolvable:$true] %s45_s11 }
  0x11   :  { %s492_s12 = scalar_lea.vmem %s23_s9, 128  ;;  %p497_p6 = scmp.lt.s32.totalorder %s23_s9, %s23_s9 }
  0x12   :  { %p493_p5 = scmp.ne.s32.totalorder %s23_s9, %s492_s12  ;;  %p498_p7 = scmp.lt.s32.totalorder %s492_s12, %s492_s12 }
  0x14   :  { %p499_p8 = por %p498_p7, %p497_p6 }
  0x16   :  { %p500_p9 = pnand %p499_p8, %p493_p5 }
  0x18   :  { %503 = shalt.err (!%p500_p9)
}
  0x19   :  { %25 = dma.hbm_to_vmem [thread:$0]  %s682_s0, 128, %s23_s9, [#allocation3]  }
  0x1a   :  { %s512_s15 = scalar_lea.vmem %s46_s11, 1024  ;;  %p517_p11 = scmp.lt.s32.totalorder %s46_s11, %s46_s11 }
  0x1b   :  { %p513_p10 = scmp.ne.s32.totalorder %s46_s11, %s512_s15  ;;  %p518_p12 = scmp.lt.s32.totalorder %s512_s15, %s512_s15 }
  0x1d   :  { %p519_p13 = por %p518_p12, %p517_p11 }
  0x1f   :  { %p520_p0 = pnand %p519_p13, %p513_p10 }
  0x21   :  { %523 = shalt.err (!%p520_p0)
}
  0x22   :  { %51 = dma.hbm_to_vmem [thread:$0]  %s685_s3, 1024, %s46_s11, [#allocation6], %s573_s27, %s573_s27, %s574_s28  }
  0x23   :  { %s577_s17 = smov [#allocation8]  }
  0x24   :  { %s59_s18 = sshll.u32 %s577_s17, 4  ;;  %s60_s18 = int_to_ptr.vmem [resolvable:$true] %s59_s18 }
  0x25   :  { %s532_s19 = scalar_lea.vmem %s60_s18, 1024  ;;  %p537_p2 = scmp.lt.s32.totalorder %s60_s18, %s60_s18 }
  0x26   :  { %p533_p1 = scmp.ne.s32.totalorder %s60_s18, %s532_s19  ;;  %p538_p3 = scmp.lt.s32.totalorder %s532_s19, %s532_s19 }
  0x28   :  { %p539_p4 = por %p538_p3, %p537_p2 }
  0x2a   :  { %p540_p5 = pnand %p539_p4, %p533_p1 }
  0x2c   :  { %543 = shalt.err (!%p540_p5)
}
  0x2d   :  { %65 = dma.hbm_to_vmem [thread:$0]  %s687_s5, 1024, %s60_s18, [#allocation9], %s573_s27, %s573_s27, %s574_s28  }
  0x2e   :  { %564 = dma.done.wait [#allocation3], 128  }
  0x2f   :  { %565 = vsyncadd [#allocation3], 4294967168 }
  0x30   :  { %566 = dma.done.wait [#allocation6], 1536  }
  0x31   :  { %567 = vsyncadd [#allocation6], 4294965760 }
  0x32   :  { %568 = dma.done.wait [#allocation9], 1024  }
  0x33   :  { %569 = vsyncadd [#allocation9], 4294966272  ;;  %v578_v0 = vmov 0.0   ;;  %vm579_vm0 = vmmov 0   ;;  %v84_v1 = vld [vmem:[#allocation5 + $0x18] sm:$0xff]  ;;  %v83_v2 = vld [vmem:[#allocation5 + $0x10] sm:$0xff] }
  0x34   :  { %402 = vmatprep.subr.mxu0 %v578_v0  ;;  %410 = vmatprep.mubr.msk.f32.mxu0 %vm579_vm0, %v578_v0  ;;  %v174_v3 = vld [vmem:[#allocation7 + $0x38] sm:$0xff]  ;;  %v82_v4 = vld [vmem:[#allocation5 + $0x8] sm:$0xff]  ;;  %v173_v5 = vld [vmem:[#allocation7 + $0x30] sm:$0xff]  ;;  %vm92_vm1 = vcmask 261120   ;;  %vm182_vm2 = vcmask 523264  }
  0x35   :  { %413 = vmatprep.subr.mxu1 %v578_v0  ;;  %429 = vmatprep.mubr.msk.f32.mxu1 %vm579_vm0, %v578_v0  ;;  %v172_v6 = vld [vmem:[#allocation7 + $0x28] sm:$0xff]  ;;  %v81_v7 = vld [vmem:[#allocation5] sm:$0xff]  ;;  %v80_v8 = vld [vmem:[#allocation2] sm:$0xff] }
  0x36   :  { %403 = vmatpush3.msra.mxu0 %v84_v1  ;;  %414 = vmatpush3.msra.mxu1 %v174_v3  ;;  %v171_v9 = vld [vmem:[#allocation7 + $0x20] sm:$0xff]  ;;  %v170_v10 = vld [vmem:[#allocation7 + $0x18] sm:$0xff]  ;;  %v169_v11 = vld [vmem:[#allocation7 + $0x10] sm:$0xff] }
  0x37   :  { %404 = vmatprep.subr.mxu0 %v578_v0  ;;  %415 = vmatprep.subr.mxu1 %v578_v0  ;;  %v168_v12 = vld [vmem:[#allocation7 + $0x8] sm:$0xff]  ;;  %v167_v13 = vld [vmem:[#allocation7] sm:$0xff]  ;;  %v264_v14 = vld [vmem:[#allocation8 + $0x38] sm:$0xff] }
  0x38   :  { %405 = vmatpush3.msra.mxu0 %v83_v2  ;;  %416 = vmatpush3.msra.mxu1 %v173_v5  ;;  %v263_v15 = vld [vmem:[#allocation8 + $0x30] sm:$0xff]  ;;  %v262_v16 = vld [vmem:[#allocation8 + $0x28] sm:$0xff]  ;;  %v261_v17 = vld [vmem:[#allocation8 + $0x20] sm:$0xff] }
  0x39   :  { %406 = vmatprep.subr.mxu0 %v578_v0  ;;  %417 = vmatprep.subr.mxu1 %v578_v0  ;;  %v260_v18 = vld [vmem:[#allocation8 + $0x18] sm:$0xff]  ;;  %v259_v24 = vld [vmem:[#allocation8 + $0x10] sm:$0xff]  ;;  %v258_v25 = vld [vmem:[#allocation8 + $0x8] sm:$0xff] }
  0x3a   :  { %407 = vmatpush3.msra.mxu0 %v82_v4  ;;  %418 = vmatpush3.msra.mxu1 %v172_v6  ;;  %v373_v19 = vld [vmem:[%s684_s2] ss:$0 sm:$0xff]  ;;  %v257_v26 = vld [vmem:[#allocation8] sm:$0xff] }
  0x3b   :  { %408 = vmatprep.subr.mxu0 %v578_v0  ;;  %419 = vmatprep.subr.mxu1 %v578_v0  ;;  %v375_v27 = vld [vmem:[%s686_s4] ss:$0 sm:$0xff]  ;;  %s580_s4 = smov [#allocation10]  }
  0x3c   :  { %409 = vmatpush3.msra.mxu0 %v81_v7  ;;  %420 = vmatpush3.msra.mxu1 %v171_v9  ;;  %v377_v32 = vld [vmem:[%s688_s6] ss:$0 sm:$0xff]  ;;  %s362_s24 = sshll.u32 %s580_s4, 4  ;;  %s363_s24 = int_to_ptr.vmem [resolvable:$true] %s362_s24 }
  0x3d   :  { %411 = vmatmul.mubr.msk.f32.vlgmr.msra.gmra.mxu0 %vm92_vm1, %v80_v8  ;;  %421 = vmatprep.subr.mxu1 %v578_v0  ;;  %s544_s6 = scalar_lea.vmem %s363_s24, 128  ;;  %p549_p7 = scmp.lt.s32.totalorder %s363_s24, %s363_s24 }
  0x3e   :  { %432 = vmatprep.subr.mxu0 %v578_v0  ;;  %422 = vmatpush3.msra.mxu1 %v170_v10  ;;  %p545_p6 = scmp.ne.s32.totalorder %s363_s24, %s544_s6  ;;  %p550_p8 = scmp.lt.s32.totalorder %s544_s6, %s544_s6 }
  0x3f   :  { %448 = vmatprep.mubr.msk.f32.mxu0 %vm579_vm0, %v578_v0  ;;  %423 = vmatprep.subr.mxu1 %v578_v0 }
  0x40   :  { %424 = vmatpush3.msra.mxu1 %v169_v11  ;;  %433 = vmatpush3.msra.mxu0 %v264_v14  ;;  %p551_p9 = por %p550_p8, %p549_p7 }
  0x41   :  { %425 = vmatprep.subr.mxu1 %v578_v0  ;;  %434 = vmatprep.subr.mxu0 %v578_v0 }
  0x42   :  { %426 = vmatpush3.msra.mxu1 %v168_v12  ;;  %435 = vmatpush3.msra.mxu0 %v263_v15  ;;  %p552_p10 = pnand %p551_p9, %p545_p6 }
  0x43   :  { %427 = vmatprep.subr.mxu1 %v578_v0  ;;  %436 = vmatprep.subr.mxu0 %v578_v0 }
  0x44   :  { %428 = vmatpush3.msra.mxu1 %v167_v13  ;;  %437 = vmatpush3.msra.mxu0 %v262_v16 }
  0x45   :  { %438 = vmatprep.subr.mxu0 %v578_v0 }
  0x46   :  { %439 = vmatpush3.msra.mxu0 %v261_v17 }
  0x47   :  { %440 = vmatprep.subr.mxu0 %v578_v0 }
  0x48   :  { %441 = vmatpush3.msra.mxu0 %v260_v18 }
  0x49   :  { %442 = vmatprep.subr.mxu0 %v578_v0 }
  0x4a   :  { %443 = vmatpush3.msra.mxu0 %v259_v24 }
  0x4b   :  { %444 = vmatprep.subr.mxu0 %v578_v0 }
  0x4c   :  { %445 = vmatpush3.msra.mxu0 %v258_v25 }
  0x4d   :  { %446 = vmatprep.subr.mxu0 %v578_v0 }
  0x4e   :  { %447 = vmatpush3.msra.mxu0 %v257_v26 }
  0xfd   :  { %v162_v20 = vpop.f32.mrf.mxu0 }
  0xfe   :  { %v163_v21 = vadd.f32 %v373_v19, %v162_v20 }
  0xff   :  { %v412_v22 = vpop.f32.mrf.mxu0 }
 0x100   :  { %v166_v23 = vmax.f32 %v163_v21, 0.0 }
 0x102   :  { %430 = vmatmul.mubr.msk.f32.vlgmr.msra.gmra.mxu1 %vm182_vm2, %v166_v23 }
 0x1c2   :  { %v252_v28 = vpop.f32.mrf.mxu1 }
 0x1c3   :  { %v253_v29 = vadd.f32 %v375_v27, %v252_v28 }
 0x1c4   :  { %v431_v30 = vpop.f32.mrf.mxu1 }
 0x1c5   :  { %v256_v31 = vmax.f32 %v253_v29, 0.0 }
 0x1c7   :  { %449 = vmatmul.mubr.msk.f32.vlgmr.msra.gmra.mxu0 %vm182_vm2, %v256_v31 }
 0x287   :  { %v341_v33 = vpop.f32.mrf.mxu0 }
 0x288   :  { %v342_v34 = vadd.f32 %v377_v32, %v341_v33 }
 0x289   :  { %v450_v35 = vpop.f32.mrf.mxu0 }
 0x28a   :  { %345 = vmax.xlane.f32.xlu0 %v342_v34 }
 0x313   :  { %v346_v36 = vpop.xlane.xlu0 %345 }
 0x314   :  { %v347_v37 = vsub.f32 %v342_v34, %v346_v36 }
 0x316   :  { %v348_v38 = vmul.f32 1.442695, %v347_v37 }
 0x318   :  { %460 = vpow2.f32 %v348_v38 }
 0x325   :  { %v461_v39 = vpop.eup %460 }
 0x326   :  { %350 = vadd.xlane.f32.xlu0 %v461_v39 }
 0x3af   :  { %v351_v40 = vpop.xlane.xlu0 %350 }
 0x3b0   :  { %462 = vlog2.f32 %v351_v40 }
 0x3bd   :  { %v463_v41 = vpop.eup %462 }
 0x3be   :  { %v353_v42 = vmul.f32 0.6931472, %v463_v41 }
 0x3c0   :  { %v354_v43 = vsub.f32 %v347_v37, %v353_v42 }
 0x3c2   :  { %355 = vst [vmem:[#allocation10] sm:$0xff] %v354_v43 }
 0x3c3   :  { %555 = shalt.err (!%p552_p10)
}
 0x3c4   :  { %365 = dma.vmem_to_hbm [thread:$0]  %s363_s24, 128, %s689_s7, [#allocation4]  }
 0x3c5   :  { %570 = dma.done.wait [#allocation4], 128  }
 0x3c6   :  { %571 = vsyncadd [#allocation4], 4294967168 }
 0x3c7   :  { %369 = vsyncpa [#allocation3], 1 }
 0x3c8   :  { %370 = vsyncpa [#allocation6], 1 }
 0x3c9   :  { %371 = vsyncpa [#allocation9], 1 }
 0x3ca   :  { %372 = vsyncpa [#allocation4], 1 }

</bundles_post_ra>
